<compile_context>
chip_gen: v6e
topology: v6e:2x2x1
jax: 0.10.0
libtpu: 0.0.40
codegen_flags: <defaults>
</compile_context>

<pallas_src>
import math

import jax
import jax.numpy as jnp
from jax.experimental import pallas as pl
from jax.experimental.pallas import tpu as pltpu

NZ = 100          # latent size (nz in the PyTorch script)
NZ_PAD = 128      # latent padded to a full 128-lane tile
H1_PAD = 128      # layer-1 features padded 64 -> 128 (lane-dense)
N_OUT = 25        # final Linear output features
OUT_PAD = 128     # output padded to a full 128-lane tile
BG = 8            # rows per BN batch (one module forward), sublane-aligned
BN_EPS = 1e-5


def _bn_tanh(h, gamma, beta):
    """Training-mode BatchNorm1d (biased var, one-pass stats) + Tanh, folded to one FMA."""
    mean = jnp.mean(h, axis=0, keepdims=True)
    ex2 = jnp.mean(h * h, axis=0, keepdims=True)
    var = ex2 - mean * mean                          # biased (1/N) batch variance
    scale = gamma * jax.lax.rsqrt(var + BN_EPS)      # EUP rsqrt
    shift = beta - mean * scale
    return jnp.tanh(h * scale + shift)               # EUP tanh


def generator_kernel(x_ref, w1_ref, w2_ref, w3_ref, w4_ref, p_ref, o_ref):
    # p_ref layout (8, 128) f32 == exactly one vreg; loaded once, sliced in-register.
    #   row 0: gamma1 (cols>=64 padded with 1)   row 1: beta1 (padded 0)
    #   row 2: gamma2                            row 3: beta2
    #   row 4: gamma3                            row 5: beta3
    #   row 6: b4 (cols>=25 zero)                row 7: unused
    p = p_ref[...]
    x = x_ref[...].astype(jnp.bfloat16)                                   # (BG, 128)

    h1 = jnp.dot(x, w1_ref[...], preferred_element_type=jnp.float32)      # (BG, 128) f32
    h1 = _bn_tanh(h1, p[0:1, :], p[1:2, :])

    h2 = jnp.dot(h1.astype(jnp.bfloat16), w2_ref[...],
                 preferred_element_type=jnp.float32)                      # (BG, 128)
    h2 = _bn_tanh(h2, p[2:3, :], p[3:4, :])

    h3 = jnp.dot(h2.astype(jnp.bfloat16), w3_ref[...],
                 preferred_element_type=jnp.float32)                      # (BG, 128)
    h3 = _bn_tanh(h3, p[4:5, :], p[5:6, :])

    out = jnp.dot(h3.astype(jnp.bfloat16), w4_ref[...],
                  preferred_element_type=jnp.float32) + p[6:7, :]         # (BG, 128)
    o_ref[...] = out.astype(o_ref.dtype)


@jax.jit
def generator_forward(x_groups, params):
    """x_groups: (G, BG, 128) f32 latent, already flattened + zero-padded to 128 lanes.

    Each group of BG rows is one independent training-mode-BN batch (== one call of
    the PyTorch module).  Returns (G, BG, 128) f32; output columns >= 25 are exact
    zeros — slice in the consumer, not around the kernel.
    """
    G = x_groups.shape[0]
    w1, w2, w3, w4, packed = params
    const = lambda g: (0, 0)

    return pl.pallas_call(
        generator_kernel,
        out_shape=jax.ShapeDtypeStruct((G, BG, OUT_PAD), jnp.float32),
        grid=(G,),
        in_specs=[
            pl.BlockSpec((None, BG, NZ_PAD), lambda g: (g, 0, 0)),  # per-group latent
            pl.BlockSpec((NZ_PAD, H1_PAD), const),                  # w1 (bf16)
            pl.BlockSpec((H1_PAD, 128), const),                     # w2 (bf16)
            pl.BlockSpec((128, 128), const),                        # w3 (bf16)
            pl.BlockSpec((128, OUT_PAD), const),                    # w4 (bf16)
            pl.BlockSpec((8, 128), const),                          # packed BN/bias (f32)
        ],
        out_specs=pl.BlockSpec((None, BG, OUT_PAD), lambda g: (g, 0, 0)),
        compiler_params=pltpu.CompilerParams(
            dimension_semantics=("parallel",)),   # shard groups across v7x's 2 TCs
    )(x_groups, w1, w2, w3, w4, packed)


def init_params(key):
    """Deterministic params mimicking PyTorch defaults.

    Linear weights are stored pre-transposed as (in, out), zero-padded to 128 on
    every ragged dim, and cast to bf16 (single-pass MXU).  Linear biases b1/b2/b3
    are omitted (cancelled by training-mode BN).  BN gamma/beta and the final bias
    stay f32, packed into one (8, 128) operand.
    """
    keys = jax.random.split(key, 11)

    def u(k, shape, fan_in):
        bound = 1.0 / math.sqrt(float(fan_in))
        return jax.random.uniform(k, shape, jnp.float32, -bound, bound)

    w1 = jnp.zeros((NZ_PAD, H1_PAD), jnp.float32).at[:NZ, :64].set(u(keys[0], (NZ, 64), NZ))
    w2 = jnp.zeros((H1_PAD, 128), jnp.float32).at[:64, :].set(u(keys[1], (64, 128), 64))
    w3 = u(keys[2], (128, 128), 128)
    w4 = jnp.zeros((128, OUT_PAD), jnp.float32).at[:, :N_OUT].set(u(keys[3], (128, N_OUT), 128))
    b4 = jnp.zeros((OUT_PAD,), jnp.float32).at[:N_OUT].set(u(keys[4], (N_OUT,), 128))

    # Nontrivial (but deterministic) BN affine params to exercise the BN path.
    g1 = 1.0 + 0.1 * jax.random.normal(keys[5], (64,), jnp.float32)
    be1 = 0.1 * jax.random.normal(keys[6], (64,), jnp.float32)
    g2 = 1.0 + 0.1 * jax.random.normal(keys[7], (128,), jnp.float32)
    be2 = 0.1 * jax.random.normal(keys[8], (128,), jnp.float32)
    g3 = 1.0 + 0.1 * jax.random.normal(keys[9], (128,), jnp.float32)
    be3 = 0.1 * jax.random.normal(keys[10], (128,), jnp.float32)

    packed = jnp.zeros((8, 128), jnp.float32)
    packed = packed.at[0, :].set(1.0).at[0, :64].set(g1)   # gamma1: pad = 1
    packed = packed.at[1, :64].set(be1)                    # beta1:  pad = 0
    packed = packed.at[2, :].set(g2)
    packed = packed.at[3, :].set(be2)
    packed = packed.at[4, :].set(g3)
    packed = packed.at[5, :].set(be3)
    packed = packed.at[6, :].set(b4)

    return (w1.astype(jnp.bfloat16), w2.astype(jnp.bfloat16),
            w3.astype(jnp.bfloat16), w4.astype(jnp.bfloat16), packed)


def generator_reference(x_groups, params):
    """Pure-JAX reference with the same numerics (bf16 at dot boundaries, f32 BN/Tanh)."""
    w1, w2, w3, w4, packed = params

    def dot(a, w):
        return jnp.dot(a.astype(jnp.bfloat16), w, preferred_element_type=jnp.float32)

    def bn_tanh(h, g, b):
        m = jnp.mean(h, axis=0, keepdims=True)
        v = jnp.mean(jnp.square(h - m), axis=0, keepdims=True)   # two-pass biased var
        return jnp.tanh((h - m) * jax.lax.rsqrt(v + BN_EPS) * g + b)

    def one_group(xg):
        h1 = bn_tanh(dot(xg, w1), packed[0], packed[1])
        h2 = bn_tanh(dot(h1, w2), packed[2], packed[3])
        h3 = bn_tanh(dot(h2, w3), packed[4], packed[5])
        return dot(h3, w4) + packed[6]

    return jax.vmap(one_group)(x_groups)


if __name__ == "__main__":
    G = 4                                   # independent BN batches per pallas_call
    key = jax.random.PRNGKey(0)
    k_x, k_p = jax.random.split(key)

    # DCGAN-style latent in NCHW, (B, nz, 1, 1) with B = G*BG rows.
    x_nchw = jax.random.normal(k_x, (G * BG, NZ, 1, 1), jnp.float32)
    params = init_params(k_p)

    # One-time upstream data prep (outside the fused forward): nn.Flatten and
    # zero-pad the latent to a lane-dense 128-wide slab, grouped per BN batch.
    x_groups = jnp.pad(x_nchw.reshape(G, BG, NZ), ((0, 0), (0, 0), (0, NZ_PAD - NZ)))

    out_padded = jax.block_until_ready(generator_forward(x_groups, params))
    assert out_padded.shape == (G, BG, OUT_PAD), out_padded.shape
    assert jnp.isfinite(out_padded).all()

    out = out_padded[..., :N_OUT].reshape(G * BG, N_OUT)   # consumer-side slice

    ref = generator_reference(x_groups, params)[..., :N_OUT].reshape(G * BG, N_OUT)
    max_err = float(jnp.max(jnp.abs(out - ref)))
    assert max_err < 1e-2, f"mismatch vs reference: {max_err}"

    print("KERNEL_OK")
</pallas_src>

<mosaic_0001>
module attributes {stable_mosaic.version = 11 : i64} {
  func.func @generator_kernel(%arg0: i32, %arg1: memref<1x8x128xf32, #tpu.memory_space<vmem>>, %arg2: memref<128x128xbf16, #tpu.memory_space<vmem>>, %arg3: memref<128x128xbf16, #tpu.memory_space<vmem>>, %arg4: memref<128x128xbf16, #tpu.memory_space<vmem>>, %arg5: memref<128x128xbf16, #tpu.memory_space<vmem>>, %arg6: memref<8x128xf32, #tpu.memory_space<vmem>>, %arg7: memref<1x8x128xf32, #tpu.memory_space<vmem>>) attributes {dimension_semantics = [#tpu.dimension_semantics<parallel>], iteration_bounds = array<i64: 4>, scalar_prefetch = 0 : i64, scratch_operands = 0 : i64, tpu.core_type = #tpu.core_type<tc>, window_params = [{transform_indices = @transform_0, window_bounds = array<i64: 1, 8, 128>}, {pipeline_mode = #tpu.pipeline_mode<synchronous>, transform_indices = @transform_1, window_bounds = array<i64: 128, 128>}, {pipeline_mode = #tpu.pipeline_mode<synchronous>, transform_indices = @transform_2, window_bounds = array<i64: 128, 128>}, {pipeline_mode = #tpu.pipeline_mode<synchronous>, transform_indices = @transform_3, window_bounds = array<i64: 128, 128>}, {pipeline_mode = #tpu.pipeline_mode<synchronous>, transform_indices = @transform_4, window_bounds = array<i64: 128, 128>}, {pipeline_mode = #tpu.pipeline_mode<synchronous>, transform_indices = @transform_5, window_bounds = array<i64: 8, 128>}, {transform_indices = @transform_6, window_bounds = array<i64: 1, 8, 128>}]} {
    %c0 = arith.constant 0 : index
    %c0_0 = arith.constant 0 : index
    %0 = vector.load %arg6[%c0, %c0_0] : memref<8x128xf32, #tpu.memory_space<vmem>>, vector<8x128xf32>
    %c0_1 = arith.constant 0 : index
    %c0_2 = arith.constant 0 : index
    %c0_3 = arith.constant 0 : index
    %1 = vector.load %arg1[%c0_1, %c0_2, %c0_3] : memref<1x8x128xf32, #tpu.memory_space<vmem>>, vector<1x8x128xf32>
    %2 = vector.shape_cast %1 : vector<1x8x128xf32> to vector<8x128xf32>
    %3 = arith.truncf %2 : vector<8x128xf32> to vector<8x128xbf16>
    %c0_4 = arith.constant 0 : index
    %c0_5 = arith.constant 0 : index
    %4 = vector.load %arg2[%c0_4, %c0_5] : memref<128x128xbf16, #tpu.memory_space<vmem>>, vector<128x128xbf16>
    %cst = arith.constant dense<0.000000e+00> : vector<8x128xf32>
    %5 = tpu.matmul %3, %4, %cst {dimension_numbers = #tpu.dot_dimension_numbers<[1], [0], [0], [1], [0, 0, 1, 1], [], []>} : vector<8x128xbf16>, vector<128x128xbf16>, vector<8x128xf32> -> vector<8x128xf32>
    %6 = vector.extract_strided_slice %0 {offsets = [0, 0], sizes = [1, 128], strides = [1, 1]} : vector<8x128xf32> to vector<1x128xf32>
    %7 = vector.extract_strided_slice %0 {offsets = [1, 0], sizes = [1, 128], strides = [1, 1]} : vector<8x128xf32> to vector<1x128xf32>
    %cst_6 = arith.constant dense<0.000000e+00> : vector<128xf32>
    %8 = vector.multi_reduction <add>, %5, %cst_6 [0] : vector<8x128xf32> to vector<128xf32>
    %9 = vector.shape_cast %8 : vector<128xf32> to vector<1x128xf32>
    %cst_7 = arith.constant 8.000000e+00 : f32
    %10 = vector.broadcast %cst_7 : f32 to vector<1x128xf32>
    %11 = arith.divf %9, %10 : vector<1x128xf32>
    %12 = arith.mulf %5, %5 : vector<8x128xf32>
    %cst_8 = arith.constant dense<0.000000e+00> : vector<128xf32>
    %13 = vector.multi_reduction <add>, %12, %cst_8 [0] : vector<8x128xf32> to vector<128xf32>
    %14 = vector.shape_cast %13 : vector<128xf32> to vector<1x128xf32>
    %cst_9 = arith.constant 8.000000e+00 : f32
    %15 = vector.broadcast %cst_9 : f32 to vector<1x128xf32>
    %16 = arith.divf %14, %15 : vector<1x128xf32>
    %17 = arith.mulf %11, %11 : vector<1x128xf32>
    %18 = arith.subf %16, %17 : vector<1x128xf32>
    %cst_10 = arith.constant 9.99999974E-6 : f32
    %19 = vector.broadcast %cst_10 : f32 to vector<1x128xf32>
    %20 = arith.addf %18, %19 : vector<1x128xf32>
    %21 = math.rsqrt %20 : vector<1x128xf32>
    %22 = arith.mulf %6, %21 : vector<1x128xf32>
    %23 = arith.mulf %11, %22 : vector<1x128xf32>
    %24 = arith.subf %7, %23 : vector<1x128xf32>
    %25 = vector.broadcast %22 : vector<1x128xf32> to vector<8x128xf32>
    %26 = arith.mulf %5, %25 : vector<8x128xf32>
    %27 = vector.broadcast %24 : vector<1x128xf32> to vector<8x128xf32>
    %28 = arith.addf %26, %27 : vector<8x128xf32>
    %29 = math.tanh %28 : vector<8x128xf32>
    %30 = arith.truncf %29 : vector<8x128xf32> to vector<8x128xbf16>
    %c0_11 = arith.constant 0 : index
    %c0_12 = arith.constant 0 : index
    %31 = vector.load %arg3[%c0_11, %c0_12] : memref<128x128xbf16, #tpu.memory_space<vmem>>, vector<128x128xbf16>
    %cst_13 = arith.constant dense<0.000000e+00> : vector<8x128xf32>
    %32 = tpu.matmul %30, %31, %cst_13 {dimension_numbers = #tpu.dot_dimension_numbers<[1], [0], [0], [1], [0, 0, 1, 1], [], []>} : vector<8x128xbf16>, vector<128x128xbf16>, vector<8x128xf32> -> vector<8x128xf32>
    %33 = vector.extract_strided_slice %0 {offsets = [2, 0], sizes = [1, 128], strides = [1, 1]} : vector<8x128xf32> to vector<1x128xf32>
    %34 = vector.extract_strided_slice %0 {offsets = [3, 0], sizes = [1, 128], strides = [1, 1]} : vector<8x128xf32> to vector<1x128xf32>
    %cst_14 = arith.constant dense<0.000000e+00> : vector<128xf32>
    %35 = vector.multi_reduction <add>, %32, %cst_14 [0] : vector<8x128xf32> to vector<128xf32>
    %36 = vector.shape_cast %35 : vector<128xf32> to vector<1x128xf32>
    %cst_15 = arith.constant 8.000000e+00 : f32
    %37 = vector.broadcast %cst_15 : f32 to vector<1x128xf32>
    %38 = arith.divf %36, %37 : vector<1x128xf32>
    %39 = arith.mulf %32, %32 : vector<8x128xf32>
    %cst_16 = arith.constant dense<0.000000e+00> : vector<128xf32>
    %40 = vector.multi_reduction <add>, %39, %cst_16 [0] : vector<8x128xf32> to vector<128xf32>
    %41 = vector.shape_cast %40 : vector<128xf32> to vector<1x128xf32>
    %cst_17 = arith.constant 8.000000e+00 : f32
    %42 = vector.broadcast %cst_17 : f32 to vector<1x128xf32>
    %43 = arith.divf %41, %42 : vector<1x128xf32>
    %44 = arith.mulf %38, %38 : vector<1x128xf32>
    %45 = arith.subf %43, %44 : vector<1x128xf32>
    %cst_18 = arith.constant 9.99999974E-6 : f32
    %46 = vector.broadcast %cst_18 : f32 to vector<1x128xf32>
    %47 = arith.addf %45, %46 : vector<1x128xf32>
    %48 = math.rsqrt %47 : vector<1x128xf32>
    %49 = arith.mulf %33, %48 : vector<1x128xf32>
    %50 = arith.mulf %38, %49 : vector<1x128xf32>
    %51 = arith.subf %34, %50 : vector<1x128xf32>
    %52 = vector.broadcast %49 : vector<1x128xf32> to vector<8x128xf32>
    %53 = arith.mulf %32, %52 : vector<8x128xf32>
    %54 = vector.broadcast %51 : vector<1x128xf32> to vector<8x128xf32>
    %55 = arith.addf %53, %54 : vector<8x128xf32>
    %56 = math.tanh %55 : vector<8x128xf32>
    %57 = arith.truncf %56 : vector<8x128xf32> to vector<8x128xbf16>
    %c0_19 = arith.constant 0 : index
    %c0_20 = arith.constant 0 : index
    %58 = vector.load %arg4[%c0_19, %c0_20] : memref<128x128xbf16, #tpu.memory_space<vmem>>, vector<128x128xbf16>
    %cst_21 = arith.constant dense<0.000000e+00> : vector<8x128xf32>
    %59 = tpu.matmul %57, %58, %cst_21 {dimension_numbers = #tpu.dot_dimension_numbers<[1], [0], [0], [1], [0, 0, 1, 1], [], []>} : vector<8x128xbf16>, vector<128x128xbf16>, vector<8x128xf32> -> vector<8x128xf32>
    %60 = vector.extract_strided_slice %0 {offsets = [4, 0], sizes = [1, 128], strides = [1, 1]} : vector<8x128xf32> to vector<1x128xf32>
    %61 = vector.extract_strided_slice %0 {offsets = [5, 0], sizes = [1, 128], strides = [1, 1]} : vector<8x128xf32> to vector<1x128xf32>
    %cst_22 = arith.constant dense<0.000000e+00> : vector<128xf32>
    %62 = vector.multi_reduction <add>, %59, %cst_22 [0] : vector<8x128xf32> to vector<128xf32>
    %63 = vector.shape_cast %62 : vector<128xf32> to vector<1x128xf32>
    %cst_23 = arith.constant 8.000000e+00 : f32
    %64 = vector.broadcast %cst_23 : f32 to vector<1x128xf32>
    %65 = arith.divf %63, %64 : vector<1x128xf32>
    %66 = arith.mulf %59, %59 : vector<8x128xf32>
    %cst_24 = arith.constant dense<0.000000e+00> : vector<128xf32>
    %67 = vector.multi_reduction <add>, %66, %cst_24 [0] : vector<8x128xf32> to vector<128xf32>
    %68 = vector.shape_cast %67 : vector<128xf32> to vector<1x128xf32>
    %cst_25 = arith.constant 8.000000e+00 : f32
    %69 = vector.broadcast %cst_25 : f32 to vector<1x128xf32>
    %70 = arith.divf %68, %69 : vector<1x128xf32>
    %71 = arith.mulf %65, %65 : vector<1x128xf32>
    %72 = arith.subf %70, %71 : vector<1x128xf32>
    %cst_26 = arith.constant 9.99999974E-6 : f32
    %73 = vector.broadcast %cst_26 : f32 to vector<1x128xf32>
    %74 = arith.addf %72, %73 : vector<1x128xf32>
    %75 = math.rsqrt %74 : vector<1x128xf32>
    %76 = arith.mulf %60, %75 : vector<1x128xf32>
    %77 = arith.mulf %65, %76 : vector<1x128xf32>
    %78 = arith.subf %61, %77 : vector<1x128xf32>
    %79 = vector.broadcast %76 : vector<1x128xf32> to vector<8x128xf32>
    %80 = arith.mulf %59, %79 : vector<8x128xf32>
    %81 = vector.broadcast %78 : vector<1x128xf32> to vector<8x128xf32>
    %82 = arith.addf %80, %81 : vector<8x128xf32>
    %83 = math.tanh %82 : vector<8x128xf32>
    %84 = arith.truncf %83 : vector<8x128xf32> to vector<8x128xbf16>
    %c0_27 = arith.constant 0 : index
    %c0_28 = arith.constant 0 : index
    %85 = vector.load %arg5[%c0_27, %c0_28] : memref<128x128xbf16, #tpu.memory_space<vmem>>, vector<128x128xbf16>
    %cst_29 = arith.constant dense<0.000000e+00> : vector<8x128xf32>
    %86 = tpu.matmul %84, %85, %cst_29 {dimension_numbers = #tpu.dot_dimension_numbers<[1], [0], [0], [1], [0, 0, 1, 1], [], []>} : vector<8x128xbf16>, vector<128x128xbf16>, vector<8x128xf32> -> vector<8x128xf32>
    %87 = vector.extract_strided_slice %0 {offsets = [6, 0], sizes = [1, 128], strides = [1, 1]} : vector<8x128xf32> to vector<1x128xf32>
    %88 = vector.broadcast %87 : vector<1x128xf32> to vector<8x128xf32>
    %89 = arith.addf %86, %88 : vector<8x128xf32>
    %c0_30 = arith.constant 0 : index
    %c0_31 = arith.constant 0 : index
    %c0_32 = arith.constant 0 : index
    %90 = vector.load %arg7[%c0_30, %c0_31, %c0_32] : memref<1x8x128xf32, #tpu.memory_space<vmem>>, vector<1x8x128xf32>
    %91 = vector.shape_cast %90 : vector<1x8x128xf32> to vector<8x128xf32>
    %92 = vector.shape_cast %89 : vector<8x128xf32> to vector<1x8x128xf32>
    tpu.vector_store %arg7[%c0_30, %c0_31, %c0_32], %92 {strides = array<i32>} : memref<1x8x128xf32, #tpu.memory_space<vmem>>, vector<1x8x128xf32>,
    return
  }
  func.func @transform_0(%arg0: i32) -> (i32, i32, i32) {
    %c0_i32 = arith.constant 0 : i32
    %c0_i32_0 = arith.constant 0 : i32
    %c0_i32_1 = arith.constant 0 : i32
    return %arg0, %c0_i32, %c0_i32_0 : i32, i32, i32
  }
  func.func @transform_1(%arg0: i32) -> (i32, i32) {
    %c0_i32 = arith.constant 0 : i32
    %c0_i32_0 = arith.constant 0 : i32
    %c0_i32_1 = arith.constant 0 : i32
    return %c0_i32, %c0_i32_0 : i32, i32
  }
  func.func @transform_2(%arg0: i32) -> (i32, i32) {
    %c0_i32 = arith.constant 0 : i32
    %c0_i32_0 = arith.constant 0 : i32
    %c0_i32_1 = arith.constant 0 : i32
    return %c0_i32, %c0_i32_0 : i32, i32
  }
  func.func @transform_3(%arg0: i32) -> (i32, i32) {
    %c0_i32 = arith.constant 0 : i32
    %c0_i32_0 = arith.constant 0 : i32
    %c0_i32_1 = arith.constant 0 : i32
    return %c0_i32, %c0_i32_0 : i32, i32
  }
  func.func @transform_4(%arg0: i32) -> (i32, i32) {
    %c0_i32 = arith.constant 0 : i32
    %c0_i32_0 = arith.constant 0 : i32
    %c0_i32_1 = arith.constant 0 : i32
    return %c0_i32, %c0_i32_0 : i32, i32
  }
  func.func @transform_5(%arg0: i32) -> (i32, i32) {
    %c0_i32 = arith.constant 0 : i32
    %c0_i32_0 = arith.constant 0 : i32
    %c0_i32_1 = arith.constant 0 : i32
    return %c0_i32, %c0_i32_0 : i32, i32
  }
  func.func @transform_6(%arg0: i32) -> (i32, i32, i32) {
    %c0_i32 = arith.constant 0 : i32
    %c0_i32_0 = arith.constant 0 : i32
    %c0_i32_1 = arith.constant 0 : i32
    return %arg0, %c0_i32, %c0_i32_0 : i32, i32, i32
  }
}

</mosaic_0001>

<bundles_post_ra>
// kernel: generator_forward.1
= control target key start
LH: loop header
LB: loop body
LE: loop exit
PB: predicated region body
PF: predicated region fallthrough
CT: control target
= control target key end

     0   :  { %s1831_s0 = inlined_call_operand.hbm [shape: f32[4,8,128], index: 0, kind: input, shape index: {}]   ;;  %s1832_s1 = inlined_call_operand.hbm [shape: bf16[128,128], index: 1, kind: input, shape index: {}]   ;;  %s1833_s2 = inlined_call_operand.hbm [shape: bf16[128,128], index: 2, kind: input, shape index: {}]   ;;  %s1834_s3 = inlined_call_operand.hbm [shape: bf16[128,128], index: 3, kind: input, shape index: {}]   ;;  %s1835_s4 = inlined_call_operand.hbm [shape: bf16[128,128], index: 4, kind: input, shape index: {}]   ;;  %s1836_s5 = inlined_call_operand.vmem [shape: f32[8,128], index: 5, kind: input, shape index: {}]   ;;  %s1837_s6 = inlined_call_operand.hbm [shape: f32[4,8,128], index: 6, kind: output, shape index: {}]  }
   0x1   :  { %1842 = sst [smem:[#allocation16_spill]] %s1832_s1 }
   0x2   :  { %11 = vsyncpa [#allocation3], 0 }
   0x3   :  { %13 = vsyncpa [#allocation3 + $0x1], 0 }
   0x4   :  { %14 = vsyncpa [#allocation6], 0 }
   0x5   :  { %15 = vsyncpa [#allocation9], 0 }
   0x6   :  { %16 = vsyncpa [#allocation4], 0 }
   0x7   :  { %18 = vsyncpa [#allocation4 + $0x1], 0  ;;  %s1538_s21 = smov 0   ;;  %s1540_s22 = smov 0  }
   0x8   :  { %s1542_s23 = smov 0   ;;  %s1544_s24 = smov 0  }
   0x9 LB: > { %s1493_s25 = smov [#allocation5]   ;;  %s1559_s27 = sadd.s32 4294967295, %s1491_s24   ;;  %s1491_s24 = sphi %s1544_s24, %s1862_s24   ;;  %s1487_s23 = sphi %s1542_s23, %s1861_s23   ;;  %s1483_s22 = sphi %s1540_s22, %s1860_s22   ;;  %s1479_s21 = sphi %s1538_s21, %s1859_s21  }
   0xa   : > { %s198_s26 = sshll.u32 %s1493_s25, 4  ;;  %p985_p0 = scmp.ge.s32.totalorder %s1491_s24, 1  ;;  %s199_s26 = int_to_ptr.vmem [resolvable:$true] %s198_s26 }
   0xb   : > { %p1838_p1 = scmp.eq.s32.totalorder %s1559_s27, 0  ;;  %p186_p2 = scmp.lt.s32.totalorder %s1491_s24, 5 }
   0xc   : > { %s1494_s29 = smov [#allocation8]   ;;  %s1495_s8 = smov [#allocation7]  }
   0xd   : > { %p1564_p3 = pnand %p985_p0, %p186_p2  ;;  %s224_s30 = sshll.u32 %s1494_s29, 4  ;;  %s1576_s30 = int_to_ptr.vmem [resolvable:$true] %s224_s30 }
   0xe   : > { %s211_s9 = sshll.u32 %s1495_s8, 4  ;;  %s1298_s10 = scalar_lea.vmem %s199_s26, 1024  ;;  %s1578_s9 = int_to_ptr.vmem [resolvable:$true] %s211_s9 }
   0xf   : > { %s1843_s28 = scalar_select %p1564_p3, 1, 0 }
  0x10   : > { %p1172_p4 = pneg %p1564_p3  ;;  %p1299_p7 = scmp.ne.s32.totalorder %s199_s26, %s1298_s10 }
  0x11   : > { %p1306_p10 = scmp.lt.s32.totalorder %s199_s26, %s199_s26  ;;  %p1307_p11 = scmp.lt.s32.totalorder %s1298_s10, %s1298_s10 }
  0x12   : > { %p1572_p5 = pnand %p1172_p4, %p1838_p1 }
  0x13   : > { %p1308_p12 = por %p1307_p11, %p1306_p10 }
  0x14   : > { %p1289_p6 = pneg %p1572_p5 }
  0x16   : > { %p1301_p8 = pnand %p1299_p7, %p1289_p6 }
  0x18   : > { %p1302_p9 = pneg %p1301_p8 }
  0x1a   : > { %p1309_p13 = pnand %p1308_p12, %p1302_p9 }
  0x1c   : > { %1312 = shalt.err (!%p1309_p13)
}
  0x1d   : > { %s1496_s11 = smov 64   ;;  %s1497_s12 = smov 4  }
  0x1e   : > { %s1845_s1 = sld [smem:[#allocation16_spill]]  ;;  %s1324_s15 = scalar_lea.vmem %s1576_s30, 1024 }
  0x1f   : > { %p1325_p0 = scmp.ne.s32.totalorder %s1576_s30, %s1324_s15  ;;  %p1332_p7 = scmp.lt.s32.totalorder %s1576_s30, %s1576_s30 }
  0x20   : > { %p1333_p8 = scmp.lt.s32.totalorder %s1324_s15, %s1324_s15 }
  0x21   : > { %p1327_p2 = pnand %p1325_p0, %p1289_p6 }
  0x22   : > { %p1334_p9 = por %p1333_p8, %p1332_p7 }
  0x23   : > { %p1328_p4 = pneg %p1327_p2 }
  0x24   : > { %1175 = dma.hbm_to_vmem [thread:$0]  (!%p1572_p5), %s1845_s1, 1024, %s199_s26, [#allocation6], %s1496_s11, %s1496_s11, %s1497_s12  }
  0x25   : > { %p1335_p10 = pnand %p1334_p9, %p1328_p4 }
  0x27   : > { %1338 = shalt.err (!%p1335_p10)
}
  0x28   : > { %1181 = dma.hbm_to_vmem [thread:$0]  (!%p1572_p5), %s1834_s3, 1024, %s1576_s30, [#allocation9], %s1496_s11, %s1496_s11, %s1497_s12  }
  0x29   : > { %s1350_s18 = scalar_lea.vmem %s1578_s9, 1024  ;;  %p1358_p0 = scmp.lt.s32.totalorder %s1578_s9, %s1578_s9 }
  0x2a   : > { %p1351_p11 = scmp.ne.s32.totalorder %s1578_s9, %s1350_s18  ;;  %p1359_p2 = scmp.lt.s32.totalorder %s1350_s18, %s1350_s18 }
  0x2c   : > { %p1353_p12 = pnand %p1351_p11, %p1289_p6  ;;  %p1360_p4 = por %p1359_p2, %p1358_p0 }
  0x2e   : > { %p1354_p13 = pneg %p1353_p12 }
  0x30   : > { %p1361_p7 = pnand %p1360_p4, %p1354_p13 }
  0x32   : > { %1364 = shalt.err (!%p1361_p7)
}
  0x33   : > { %1178 = dma.hbm_to_vmem [thread:$0]  (!%p1572_p5), %s1833_s2, 1024, %s1578_s9, [#allocation6], %s1496_s11, %s1496_s11, %s1497_s12  }
  0x34   : > { %s1498_s25 = smov [#allocation10]  }
  0x35   : > { %s237_s26 = sshll.u32 %s1498_s25, 4  ;;  %s238_s26 = int_to_ptr.vmem [resolvable:$true] %s237_s26 }
  0x36   : > { %s1376_s29 = scalar_lea.vmem %s238_s26, 1024  ;;  %p1384_p11 = scmp.lt.s32.totalorder %s238_s26, %s238_s26 }
  0x37   : > { %p1377_p8 = scmp.ne.s32.totalorder %s238_s26, %s1376_s29  ;;  %p1385_p12 = scmp.lt.s32.totalorder %s1376_s29, %s1376_s29 }
  0x39   : > { %p1379_p9 = pnand %p1377_p8, %p1289_p6  ;;  %p1386_p13 = por %p1385_p12, %p1384_p11 }
  0x3b   : > { %p1380_p10 = pneg %p1379_p9 }
  0x3d   : > { %p1387_p0 = pnand %p1386_p13, %p1380_p10 }
  0x3f   : > { %1390 = shalt.err (!%p1387_p0)
}
  0x40   : > { %1184 = dma.hbm_to_vmem [thread:$0]  (!%p1572_p5), %s1835_s4, 1024, %s238_s26, [#allocation9], %s1496_s11, %s1496_s11, %s1497_s12  }
  0x41   : > { %s984_s7 = sadd.s32 4294967294, %s1491_s24   ;;  %s1638_s9 = sadd.s32 1, %s1491_s24  }
  0x42   : > { %s28_s10 = ssub.s32 %s1491_s24, %s1638_s9  ;;  %s31_s13 = sadd.s32 1, %s1487_s23 }
  0x43   : > { %p29_p6 = scmp.eq.s32.totalorder %s28_s10, 0  ;;  %p38_p2 = scmp.ne.s32.totalorder %s1487_s23, %s1483_s22 }
  0x44   : > { %p39_p4 = scmp.eq.s32.totalorder %s1491_s24, 0  ;;  %p44_p7 = scmp.ne.s32.totalorder %s1483_s22, %s1479_s21 }
  0x45   : > { %s1649_s14 = scalar_select %p29_p6, %s1487_s23, %s31_s13  }
  0x46   : > { %p1651_p8 = por %p39_p4, %p38_p2  ;;  %p1657_p5 = por %p1838_p1, %p44_p7 }
  0x47   : > { %p173_p9 = scmp.eq.s32.totalorder %s1559_s27, 3  ;;  %p179_p10 = scmp.eq.s32.totalorder %s984_s7, 3 }
  0x48   : > { %s1847_s11 = scalar_select %p1657_p5, 1, 0 }
  0x49   : > { %p1197_p11 = scmp.lt.s32.totalorder %s1491_s24, 4  ;;  %s254_s12 = sand.u32 1, %s1487_s23  }
  0x4a   : > { %p1664_p12 = por %p173_p9, %p38_p2  ;;  %p1668_p13 = por %p179_p10, %p44_p7 }
  0x4b   : > { %s991_s18 = sshll.u32 %s254_s12, 3  ;;  %s992_s19 = sshll.u32 %s1491_s24, 7 }
  0x4c   : > { %s1848_s16 = scalar_select %p1664_p12, 1, 0 }
  0x4d   : > { %s1849_s17 = scalar_select %p1668_p13, 1, 0 }
  0x4e   : > { %s1676_s26 = scalar_lea.hbm %s1831_s0, %s992_s19  ;;  %s258_s29 = scalar_lea.vmem [#allocation2], %s991_s18 }
  0x4f   : > { %s265_s30 = sshll.u32 %s258_s29, 4  ;;  %p1680_p0 = pnand %p1197_p11, %p1651_p8  ;;  %s266_s30 = int_to_ptr.vmem [resolvable:$true] %s265_s30 }
  0x50   : > { %s255_s7 = scalar_lea.sflag [#allocation3], %s254_s12  ;;  %s1391_s10 = scalar_lea.hbm %s1676_s26, 128 }
  0x51   : > { %p1392_p6 = scmp.ne.s32.totalorder %s1676_s26, %s1391_s10  ;;  %p1393_p2 = pneg %p1680_p0 }
  0x52   : > { %s1396_s20 = scalar_lea.hbm %s1831_s0, 512  ;;  %p1397_p9 = scmp.lt.s32.totalorder %s1676_s26, %s1831_s0 }
  0x53   : > { %p1394_p4 = pnand %p1393_p2, %p1392_p6  ;;  %p1398_p8 = scmp.lt.s32.totalorder %s1396_s20, %s1391_s10 }
  0x55   : > { %p1395_p7 = pneg %p1394_p4  ;;  %p1399_p10 = por %p1398_p8, %p1397_p9 }
  0x57   : > { %p1400_p11 = pnand %p1399_p10, %p1395_p7 }
  0x59   : > { %1403 = shalt.err (!%p1400_p11)
}
  0x5a   : > { %s1404_s15 = scalar_lea.vmem %s266_s30, 128  ;;  %s1499_s12 = smov [#allocation2]  }
  0x5b   : > { %p1405_p1 = scmp.ne.s32.totalorder %s266_s30, %s1404_s15  ;;  %s1409_s29 = sshll.u32 %s1499_s12, 4  ;;  %s1410_s29 = int_to_ptr.vmem [resolvable:$false] %s1409_s29 }
  0x5c   : > { %s1411_s1 = scalar_lea.vmem %s1410_s29, 256  ;;  %p1412_p6 = scmp.lt.s32.totalorder %s266_s30, %s1410_s29 }
  0x5d   : > { %p1407_p13 = pnand %p1405_p1, %p1393_p2  ;;  %p1413_p4 = scmp.lt.s32.totalorder %s1411_s1, %s1404_s15 }
  0x5f   : > { %p1408_p12 = pneg %p1407_p13  ;;  %p1414_p5 = por %p1413_p4, %p1412_p6 }
  0x61   : > { %p1415_p3 = pnand %p1414_p5, %p1408_p12 }
  0x63   : > { %1418 = shalt.err (!%p1415_p3)
}
  0x64   : > { %1188 = dma.hbm_to_vmem [thread:$0]  (!%p1680_p0), %s1676_s26, 128, %s266_s30, %s255_s7  }
  0x65   : > { %p1851_p7 = scmp.ne.s32.totalorder %s1843_s28, 0 }
  0x66   : > { %s1701_s10 = sand.u32 (!%p1851_p7), 1, %s1483_s22   ;;  %p1852_p1 = scmp.ne.s32.totalorder (!%p1851_p7), %s1847_s11, 0 }
  0x67   : > { %274 = sbr.rel (%p1851_p7) target bundleno = 1123 (0x463), region = 44  ;;  %s994_s13 = sshll.u32 (!%p1851_p7), %s1701_s10, 3 }
  0x68   : > { %s277_s19 = scalar_lea.sflag (!%p1851_p7), [#allocation3], %s1701_s10  ;;  %s1707_s1 = scalar_lea.vmem (!%p1851_p7), [#allocation2], %s994_s13 }
  0x6c   : > { %1462 = dma.done.wait (%p1852_p1), %s277_s19, 128  }
  0x6d   : > { %1464 = vsyncadd (%p1852_p1), %s277_s19, 4294967168  ;;  %p1853_p3 = scmp.eq.s32.totalorder %s1559_s27, 0 }
  0x6f   : > { %1466 = dma.done.wait (%p1853_p3), [#allocation6], 2048   ;;  %p1854_p5 = pmov %p1853_p3 }
  0x70   : > { %p1855_p12 = pmov %p1853_p3 }
  0x71   : > { %1468 = vsyncadd (%p1854_p5), [#allocation6], 4294965248 }
  0x72   : > { %1470 = dma.done.wait (%p1855_p12), [#allocation9], 2048   ;;  %p1856_p13 = pmov %p1853_p3 }
  0x73   : > { %v1500_v0 = vmov 0.0   ;;  %vm1501_vm0 = vmmov 0   ;;  %v1243_v1 = vld [vmem:[#allocation5 + $0x38] sm:$0xff]   ;;  %v1244_v2 = vld [vmem:[#allocation5 + $0x30] sm:$0xff]   ;;  %v1245_v3 = vld [vmem:[#allocation5 + $0x28] sm:$0xff]   ;;  %v459_v41 = vlaneseq  ;;  %s1033_s26 = sshll.u32 %s1559_s27, 7 }
  0x74   : > { %1472 = vsyncadd (%p1856_p13), [#allocation9], 4294965248  ;;  %1072 = vmatprep.subr.bf16.mxu0 %v1500_v0  ;;  %1088 = vmatprep.mubr.msk.bf16.mxu0 %vm1501_vm0, %v1500_v0  ;;  %v1246_v4 = vld [vmem:[#allocation5 + $0x20] sm:$0xff]   ;;  %v1247_v5 = vld [vmem:[#allocation5 + $0x18] sm:$0xff]   ;;  %s324_s30 = scalar_lea.vmem [#allocation11], %s994_s13  ;;  %s1789_s18 = scalar_lea.hbm %s1837_s6, %s1033_s26 }
  0x75   : > { %1092 = vmatprep.subr.bf16.mxu1 %v1500_v0  ;;  %1108 = vmatprep.mubr.msk.bf16.mxu1 %vm1501_vm0, %v1500_v0  ;;  %v1248_v6 = vld [vmem:[#allocation5 + $0x10] sm:$0xff]   ;;  %v1249_v7 = vld [vmem:[#allocation5 + $0x8] sm:$0xff]   ;;  %v1250_v8 = vld [vmem:[#allocation5] sm:$0xff]   ;;  %v1746_v42 = vshrl.u32 %v459_v41, 7  ;;  %s876_s8 = sshll.u32 %s324_s30, 4  ;;  %s863_s25 = scalar_lea.sflag [#allocation4], %s1701_s10  ;;  %s1791_s8 = int_to_ptr.vmem [resolvable:$true] %s876_s8 }
  0x76   : > { %1073 = vmatpush3.bf16.msra.mxu0 %v1243_v1  ;;  %v327_v9 = vld [vmem:[%s1707_s1] sm:$0xff]  ;;  %v1253_v13 = vld [vmem:[#allocation7 + $0x28] sm:$0xff]   ;;  %v1254_v14 = vld [vmem:[#allocation7 + $0x20] sm:$0xff]   ;;  %s1419_s27 = scalar_lea.vmem %s1791_s8, 128  ;;  %p1857_p2 = scmp.ne.s32.totalorder %s1848_s16, 0 }
  0x77   : > { %1074 = vmatprep.subr.bf16.mxu0 %v1500_v0  ;;  %v328_v10 = vpack.c.bf16 %v327_v9, %v327_v9  ;;  %v1251_v11 = vld [vmem:[#allocation7 + $0x38] sm:$0xff]   ;;  %v1252_v12 = vld [vmem:[#allocation7 + $0x30] sm:$0xff]   ;;  %v1257_v17 = vld [vmem:[#allocation7 + $0x8] sm:$0xff]   ;;  %v461_v46 = vsub.s32 0, %v1746_v42  ;;  %v466_v50 = vsub.s32 1, %v1746_v42  ;;  %p1420_p0 = scmp.ne.s32.totalorder %s1791_s8, %s1419_s27  ;;  %s1502_s15 = smov [#allocation11]  }
  0x78   : > { %1093 = vmatpush3.bf16.msra.mxu1 %v1251_v11  ;;  %v1255_v15 = vld [vmem:[#allocation7 + $0x18] sm:$0xff]   ;;  %v1256_v16 = vld [vmem:[#allocation7 + $0x10] sm:$0xff]   ;;  %v1258_v18 = vld [vmem:[#allocation7] sm:$0xff]   ;;  %s1423_s12 = sshll.u32 %s1502_s15, 4  ;;  %s1424_s12 = int_to_ptr.vmem [resolvable:$false] %s1423_s12 }
  0x79   : > { %1094 = vmatprep.subr.bf16.mxu1 %v1500_v0  ;;  %v1751_v43 = vld [vmem:[%s1836_s5] sm:$0xff]  ;;  %v1259_v57 = vld [vmem:[#allocation8 + $0x38] sm:$0xff]   ;;  %v1261_v59 = vld [vmem:[#allocation8 + $0x28] sm:$0xff]   ;;  %p1421_p9 = pnand %p1420_p0, %p1857_p2  ;;  %s1425_s29 = scalar_lea.vmem %s1424_s12, 256 }
  0x7a   : > { %1075 = vmatpush3.bf16.msra.mxu0 %v1244_v2  ;;  %v1260_v58 = vld [vmem:[#allocation8 + $0x30] sm:$0xff]   ;;  %v1262_v60 = vld [vmem:[#allocation8 + $0x20] sm:$0xff]   ;;  %v1263_v61 = vld [vmem:[#allocation8 + $0x18] sm:$0xff]   ;;  %p1426_p10 = scmp.lt.s32.totalorder %s1791_s8, %s1424_s12  ;;  %p1427_p11 = scmp.lt.s32.totalorder %s1425_s29, %s1419_s27 }
  0x7b   : > { %1076 = vmatprep.subr.bf16.mxu0 %v1500_v0  ;;  %v1264_v62 = vld [vmem:[#allocation8 + $0x10] sm:$0xff]   ;;  %v1265_v63 = vld [vmem:[#allocation8 + $0x8] sm:$0xff]   ;;  %v1266_v1 = vld [vmem:[#allocation8] sm:$0xff]   ;;  %p1422_p8 = pneg %p1421_p9 }
  0x7c   : > { %1095 = vmatpush3.bf16.msra.mxu1 %v1252_v12  ;;  %v1271_v41 = vld [vmem:[#allocation10 + $0x18] sm:$0xff]   ;;  %p1428_p6 = por %p1427_p11, %p1426_p10 }
  0x7d   : > { %1096 = vmatprep.subr.bf16.mxu1 %v1500_v0 }
  0x7e   : > { %1077 = vmatpush3.bf16.msra.mxu0 %v1245_v3  ;;  %p1429_p4 = pnand %p1428_p6, %p1422_p8 }
  0x7f   : > { %1078 = vmatprep.subr.bf16.mxu0 %v1500_v0 }
  0x80   : > { %1097 = vmatpush3.bf16.msra.mxu1 %v1253_v13 }
  0x81   : > { %1098 = vmatprep.subr.bf16.mxu1 %v1500_v0 }
  0x82   : > { %1079 = vmatpush3.bf16.msra.mxu0 %v1246_v4 }
  0x83   : > { %1080 = vmatprep.subr.bf16.mxu0 %v1500_v0 }
  0x84   : > { %1099 = vmatpush3.bf16.msra.mxu1 %v1254_v14 }
  0x85   : > { %1100 = vmatprep.subr.bf16.mxu1 %v1500_v0 }
  0x86   : > { %1081 = vmatpush3.bf16.msra.mxu0 %v1247_v5 }
  0x87   : > { %1082 = vmatprep.subr.bf16.mxu0 %v1500_v0 }
  0x88   : > { %1101 = vmatpush3.bf16.msra.mxu1 %v1255_v15 }
  0x89   : > { %1102 = vmatprep.subr.bf16.mxu1 %v1500_v0 }
  0x8a   : > { %1083 = vmatpush3.bf16.msra.mxu0 %v1248_v6 }
  0x8b   : > { %1084 = vmatprep.subr.bf16.mxu0 %v1500_v0 }
  0x8c   : > { %1103 = vmatpush3.bf16.msra.mxu1 %v1256_v16 }
  0x8d   : > { %1104 = vmatprep.subr.bf16.mxu1 %v1500_v0 }
  0x8e   : > { %1085 = vmatpush3.bf16.msra.mxu0 %v1249_v7 }
  0x8f   : > { %1086 = vmatprep.subr.bf16.mxu0 %v1500_v0 }
  0x90   : > { %1105 = vmatpush3.bf16.msra.mxu1 %v1257_v17 }
  0x91   : > { %1106 = vmatprep.subr.bf16.mxu1 %v1500_v0 }
  0x92   : > { %1087 = vmatpush3.bf16.msra.mxu0 %v1250_v8 }
  0x93   : > { %1112 = vmatprep.subr.bf16.mxu0 %v1500_v0 }
  0x94   : > { %1107 = vmatpush3.bf16.msra.mxu1 %v1258_v18 }
  0x95   : > { %1089 = vmatmul.mubr.bf16.vlgmr.msra.gmra.mxu0 %v328_v10  ;;  %1132 = vmatprep.subr.bf16.mxu1 %v1500_v0 }
  0x96   : > { %1128 = vmatprep.mubr.msk.bf16.mxu0 %vm1501_vm0, %v1500_v0  ;;  %1113 = vmatpush3.bf16.msra.mxu0 %v1259_v57 }
  0x97   : > { %1114 = vmatprep.subr.bf16.mxu0 %v1500_v0 }
  0x9a   : > { %1115 = vmatpush3.bf16.msra.mxu0 %v1260_v58 }
  0x9b   : > { %1116 = vmatprep.subr.bf16.mxu0 %v1500_v0 }
  0x9e   : > { %1117 = vmatpush3.bf16.msra.mxu0 %v1261_v59 }
  0x9f   : > { %1118 = vmatprep.subr.bf16.mxu0 %v1500_v0 }
  0xa2   : > { %1119 = vmatpush3.bf16.msra.mxu0 %v1262_v60 }
  0xa3   : > { %1120 = vmatprep.subr.bf16.mxu0 %v1500_v0 }
  0xa6   : > { %1121 = vmatpush3.bf16.msra.mxu0 %v1263_v61 }
  0xa7   : > { %1122 = vmatprep.subr.bf16.mxu0 %v1500_v0 }
  0xaa   : > { %1123 = vmatpush3.bf16.msra.mxu0 %v1264_v62 }
  0xab   : > { %1124 = vmatprep.subr.bf16.mxu0 %v1500_v0 }
  0xae   : > { %1125 = vmatpush3.bf16.msra.mxu0 %v1265_v63 }
  0xaf   : > { %1126 = vmatprep.subr.bf16.mxu0 %v1500_v0 }
  0xb2   : > { %1127 = vmatpush3.bf16.msra.mxu0 %v1266_v1 }
 0x155   : > { %v427_v19 = vpop.f32.mrf.mxu0 }
 0x156   : > { %v433_v20 = vrot.slane %v427_v19, 4  ;;  %v441_v21 = vmul.f32 %v427_v19, %v427_v19 }
 0x157   : > { %v1090_v22 = vpop.f32.mrf.mxu0 }
 0x158   : > { %v434_v23 = vadd.f32 %v433_v20, %v427_v19  ;;  %v442_v24 = vrot.slane %v441_v21, 4 }
 0x159   : > { %v430_v25 = vpop.f32.mrf.mxu0 }
 0x15a   : > { %v435_v26 = vrot.slane %v434_v23, 2  ;;  %v443_v27 = vadd.f32 %v442_v24, %v441_v21 }
 0x15b   : > { %v1091_v28 = vpop.f32.mrf.mxu0 }
 0x15c   : > { %v436_v29 = vadd.f32 %v435_v26, %v434_v23  ;;  %v444_v30 = vrot.slane %v443_v27, 2  ;;  %v602_v26 = vsub.s32 2, %v1746_v42 }
 0x15e   : > { %v437_v31 = vrot.slane %v436_v29, 1  ;;  %v445_v32 = vadd.f32 %v444_v30, %v443_v27  ;;  %v607_v30 = vsub.s32 3, %v1746_v42 }
 0x160   : > { %v438_v33 = vadd.f32 %v437_v31, %v436_v29  ;;  %v446_v34 = vrot.slane %v445_v32, 1 }
 0x162   : > { %v440_v35 = vmul.f32 0.125, %v438_v33  ;;  %v447_v36 = vadd.f32 %v446_v34, %v445_v32 }
 0x164   : > { %v448_v37 = vmul.f32 0.125, %v447_v36  ;;  %v449_v38 = vmul.f32 %v440_v35, %v440_v35 }
 0x166   : > { %v450_v39 = vsub.f32 %v448_v37, %v449_v38  ;;  %v1267_v37 = vld [vmem:[#allocation10 + $0x38] sm:$0xff]   ;;  %v1268_v38 = vld [vmem:[#allocation10 + $0x30] sm:$0xff]  }
 0x168   : > { %v451_v40 = vadd.f32 1e-05, %v450_v39  ;;  %v1269_v39 = vld [vmem:[#allocation10 + $0x28] sm:$0xff]  }
 0x16a   : > { %1275 = vrsqrt.f32 %v451_v40  ;;  %v1270_v40 = vld [vmem:[#allocation10 + $0x20] sm:$0xff]  }
 0x177   : > { %v1276_v44 = vpop.eup %1275 }
 0x178   : > { %v453_v45 = vmul.f32 %v1276_v44, %v1751_v43  ;;  %v1272_v44 = vld [vmem:[#allocation10 + $0x10] sm:$0xff]  }
 0x17a   : > { %v454_v47 = vmul.f32 %v453_v45, %v440_v35  ;;  %v462_v49 = vrot.slane %v453_v45, %v461_v46  ;;  %v1273_v45 = vld [vmem:[#allocation10 + $0x8] sm:$0xff]   ;;  %v1274_v46 = vld [vmem:[#allocation10] sm:$0xff]  }
 0x17c   : > { %v456_v48 = vrot.slane %v454_v47, 7  ;;  %v463_v52 = vmul.f32 %v462_v49, %v427_v19 }
 0x17e   : > { %v458_v51 = vsub.f32 %v1751_v43, %v456_v48 }
 0x180   : > { %v467_v53 = vrot.slane %v458_v51, %v466_v50 }
 0x182   : > { %v468_v54 = vadd.f32 %v467_v53, %v463_v52 }
 0x184   : > { %1277 = vtanh.f32 %v468_v54 }
 0x191   : > { %v1278_v55 = vpop.eup %1277 }
 0x192   : > { %v470_v56 = vpack.c.bf16 %v1278_v55, %v1278_v55 }
 0x194   : > { %1109 = vmatmul.mubr.bf16.vlgmr.msra.gmra.mxu1 %v470_v56 }
 0x195   : > { %1148 = vmatprep.mubr.msk.bf16.mxu1 %vm1501_vm0, %v1500_v0  ;;  %1133 = vmatpush3.bf16.msra.mxu1 %v1267_v37 }
 0x196   : > { %1134 = vmatprep.subr.bf16.mxu1 %v1500_v0 }
 0x199   : > { %1135 = vmatpush3.bf16.msra.mxu1 %v1268_v38 }
 0x19a   : > { %1136 = vmatprep.subr.bf16.mxu1 %v1500_v0 }
 0x19d   : > { %1137 = vmatpush3.bf16.msra.mxu1 %v1269_v39 }
 0x19e   : > { %1138 = vmatprep.subr.bf16.mxu1 %v1500_v0 }
 0x1a1   : > { %1139 = vmatpush3.bf16.msra.mxu1 %v1270_v40 }
 0x1a2   : > { %1140 = vmatprep.subr.bf16.mxu1 %v1500_v0 }
 0x1a5   : > { %1141 = vmatpush3.bf16.msra.mxu1 %v1271_v41 }
 0x1a6   : > { %1142 = vmatprep.subr.bf16.mxu1 %v1500_v0 }
 0x1a9   : > { %1143 = vmatpush3.bf16.msra.mxu1 %v1272_v44 }
 0x1aa   : > { %1144 = vmatprep.subr.bf16.mxu1 %v1500_v0 }
 0x1ad   : > { %1145 = vmatpush3.bf16.msra.mxu1 %v1273_v45 }
 0x1ae   : > { %1146 = vmatprep.subr.bf16.mxu1 %v1500_v0 }
 0x1b1   : > { %1147 = vmatpush3.bf16.msra.mxu1 %v1274_v46 }
 0x254   : > { %v569_v2 = vpop.f32.mrf.mxu1 }
 0x255   : > { %v575_v3 = vrot.slane %v569_v2, 4  ;;  %v582_v4 = vmul.f32 %v569_v2, %v569_v2 }
 0x256   : > { %v1110_v5 = vpop.f32.mrf.mxu1 }
 0x257   : > { %v576_v6 = vadd.f32 %v575_v3, %v569_v2  ;;  %v583_v7 = vrot.slane %v582_v4, 4 }
 0x258   : > { %v572_v8 = vpop.f32.mrf.mxu1 }
 0x259   : > { %v577_v9 = vrot.slane %v576_v6, 2  ;;  %v584_v10 = vadd.f32 %v583_v7, %v582_v4  ;;  %v743_v7 = vsub.s32 4, %v1746_v42 }
 0x25a   : > { %v1111_v11 = vpop.f32.mrf.mxu1 }
 0x25b   : > { %v578_v12 = vadd.f32 %v577_v9, %v576_v6  ;;  %v585_v13 = vrot.slane %v584_v10, 2  ;;  %v748_v11 = vsub.s32 5, %v1746_v42 }
 0x25d   : > { %v579_v14 = vrot.slane %v578_v12, 1  ;;  %v586_v15 = vadd.f32 %v585_v13, %v584_v10 }
 0x25f   : > { %v580_v16 = vadd.f32 %v579_v14, %v578_v12  ;;  %v587_v17 = vrot.slane %v586_v15, 1 }
 0x261   : > { %v581_v18 = vmul.f32 0.125, %v580_v16  ;;  %v588_v19 = vadd.f32 %v587_v17, %v586_v15 }
 0x263   : > { %v589_v20 = vmul.f32 0.125, %v588_v19  ;;  %v590_v21 = vmul.f32 %v581_v18, %v581_v18 }
 0x265   : > { %v591_v22 = vsub.f32 %v589_v20, %v590_v21 }
 0x267   : > { %v592_v23 = vadd.f32 1e-05, %v591_v22 }
 0x269   : > { %1279 = vrsqrt.f32 %v592_v23 }
 0x276   : > { %v1280_v24 = vpop.eup %1279 }
 0x277   : > { %v594_v25 = vmul.f32 %v1280_v24, %v1751_v43 }
 0x279   : > { %v595_v27 = vmul.f32 %v594_v25, %v581_v18  ;;  %v603_v29 = vrot.slane %v594_v25, %v602_v26  ;;  %v771_v18 = vsub.s32 6, %v1746_v42 }
 0x27b   : > { %v597_v28 = vrot.slane %v595_v27, 7  ;;  %v604_v32 = vmul.f32 %v603_v29, %v569_v2  ;;  %v772_v19 = vrot.slane %v1751_v43, %v771_v18 }
 0x27d   : > { %v599_v31 = vsub.f32 %v1751_v43, %v597_v28 }
 0x27f   : > { %v608_v33 = vrot.slane %v599_v31, %v607_v30 }
 0x281   : > { %v609_v34 = vadd.f32 %v608_v33, %v604_v32 }
 0x283   : > { %1281 = vtanh.f32 %v609_v34 }
 0x290   : > { %v1282_v35 = vpop.eup %1281 }
 0x291   : > { %v611_v36 = vpack.c.bf16 %v1282_v35, %v1282_v35 }
 0x293   : > { %1129 = vmatmul.mubr.bf16.vlgmr.msra.gmra.mxu0 %v611_v36 }
 0x353   : > { %v710_v47 = vpop.f32.mrf.mxu0 }
 0x354   : > { %v716_v48 = vrot.slane %v710_v47, 4  ;;  %v723_v49 = vmul.f32 %v710_v47, %v710_v47 }
 0x355   : > { %v1130_v50 = vpop.f32.mrf.mxu0 }
 0x356   : > { %v717_v51 = vadd.f32 %v716_v48, %v710_v47  ;;  %v724_v52 = vrot.slane %v723_v49, 4 }
 0x357   : > { %v713_v53 = vpop.f32.mrf.mxu0 }
 0x358   : > { %v718_v54 = vrot.slane %v717_v51, 2  ;;  %v725_v55 = vadd.f32 %v724_v52, %v723_v49 }
 0x359   : > { %v1131_v56 = vpop.f32.mrf.mxu0 }
 0x35a   : > { %v719_v57 = vadd.f32 %v718_v54, %v717_v51  ;;  %v726_v58 = vrot.slane %v725_v55, 2 }
 0x35c   : > { %v720_v59 = vrot.slane %v719_v57, 1  ;;  %v727_v60 = vadd.f32 %v726_v58, %v725_v55 }
 0x35e   : > { %v721_v61 = vadd.f32 %v720_v59, %v719_v57  ;;  %v728_v62 = vrot.slane %v727_v60, 1 }
 0x360   : > { %v722_v63 = vmul.f32 0.125, %v721_v61  ;;  %v729_v1 = vadd.f32 %v728_v62, %v727_v60 }
 0x362   : > { %v730_v0 = vmul.f32 0.125, %v729_v1  ;;  %v731_v2 = vmul.f32 %v722_v63, %v722_v63 }
 0x364   : > { %v732_v3 = vsub.f32 %v730_v0, %v731_v2 }
 0x366   : > { %v733_v4 = vadd.f32 1e-05, %v732_v3 }
 0x368   : > { %1283 = vrsqrt.f32 %v733_v4 }
 0x375   : > { %v1284_v5 = vpop.eup %1283 }
 0x376   : > { %v735_v6 = vmul.f32 %v1284_v5, %v1751_v43 }
 0x378   : > { %v736_v8 = vmul.f32 %v735_v6, %v722_v63  ;;  %v744_v10 = vrot.slane %v735_v6, %v743_v7 }
 0x37a   : > { %v738_v9 = vrot.slane %v736_v8, 7  ;;  %v745_v13 = vmul.f32 %v744_v10, %v710_v47 }
 0x37c   : > { %v740_v12 = vsub.f32 %v1751_v43, %v738_v9 }
 0x37e   : > { %v749_v14 = vrot.slane %v740_v12, %v748_v11 }
 0x380   : > { %v750_v15 = vadd.f32 %v749_v14, %v745_v13 }
 0x382   : > { %1285 = vtanh.f32 %v750_v15 }
 0x38f   : > { %v1286_v16 = vpop.eup %1285 }
 0x390   : > { %v752_v17 = vpack.c.bf16 %v1286_v16, %v1286_v16 }
 0x392   : > { %1149 = vmatmul.mubr.bf16.vlgmr.msra.gmra.mxu1 %v752_v17 }
 0x452   : > { %v855_v20 = vpop.f32.mrf.mxu1 }
 0x453   : > { %v856_v21 = vadd.f32 %v855_v20, %v772_v19 }
 0x454   : > { %v1150_v22 = vpop.f32.mrf.mxu1 }
 0x455   : > { %861 = vst [vmem:[%s324_s30] sm:$0xff] %v856_v21 }
 0x456   : > { %v858_v42 = vpop.f32.mrf.mxu1 }
 0x457   : > { %1432 = shalt.err (!%p1429_p4)
}
 0x458   : > { %s1433_s13 = scalar_lea.hbm %s1789_s18, 128  ;;  %s1437_s1 = scalar_lea.hbm %s1837_s6, 512 }
 0x459   : > { %p1434_p7 = scmp.ne.s32.totalorder %s1789_s18, %s1433_s13  ;;  %p1438_p5 = scmp.lt.s32.totalorder %s1789_s18, %s1837_s6 }
 0x45a   : > { %p1439_p12 = scmp.lt.s32.totalorder %s1437_s1, %s1433_s13 }
 0x45b   : > { %p1435_p1 = pnand %p1434_p7, %p1857_p2 }
 0x45c   : > { %p1440_p13 = por %p1439_p12, %p1438_p5 }
 0x45d   : > { %p1436_p3 = pneg %p1435_p1 }
 0x45f   : > { %p1441_p0 = pnand %p1440_p13, %p1436_p3 }
 0x461   : > { %1444 = shalt.err (!%p1441_p0)
}
 0x462   : > { %1170 = dma.vmem_to_hbm [thread:$0]  (%p1857_p2), %s1791_s8, 128, %s1789_s18, %s863_s25   ;;  %v1151_v43 = vpop.f32.mrf.mxu1 }
 0x463 PF: > { %p1202_p9 = scmp.ge.s32.totalorder %s1491_s24, 2  ;;  %s888_s26 = sand.u32 1, %s1479_s21  }
 0x464   : > { %p1858_p8 = scmp.ne.s32.totalorder %s1849_s17, 0  ;;  %s889_s30 = scalar_lea.sflag [#allocation4], %s888_s26 }
 0x466   : > { %p1190_p10 = pnand %p1202_p9, %p1858_p8 }
 0x468   : > { %p1191_p11 = pneg %p1190_p10 }
 0x46a   : > { %1474 = dma.done.wait (%p1191_p11), %s889_s30, 128  }
 0x46b   : > { %1476 = vsyncadd (%p1191_p11), %s889_s30, 4294967168  ;;  %p21_p6 = scmp.ge.s32.totalorder %s1638_s9, 6   ;;  %s1859_s21 = smov %s1483_s22 }
 0x46c   : > { %s1860_s22 = smov %s1487_s23  ;;  %s1861_s23 = smov %s1649_s14 }
 0x46d   : > { %s1862_s24 = smov %s1638_s9  ;;  %23 = sbr.rel (!%p21_p6) target bundleno = 9 (0x9), region = 105 }
 0x472   :  { %894 = vsyncpa [#allocation3], 1 }
 0x473   :  { %896 = vsyncpa [#allocation3 + $0x1], 1 }
 0x474   :  { %897 = vsyncpa [#allocation6], 1 }
 0x475   :  { %898 = vsyncpa [#allocation9], 1 }
 0x476   :  { %899 = vsyncpa [#allocation4], 1 }
 0x477   :  { %901 = vsyncpa [#allocation4 + $0x1], 1 }

</bundles_post_ra>
